<compile_context>
chip_gen: v5e
topology: v5e:2x2
jax: 0.10.0
libtpu: 0.0.40
codegen_flags: <defaults>
</compile_context>

<pallas_src>
import jax
import jax.numpy as jnp
from jax.experimental import pallas as pl
from jax.experimental.pallas import tpu as pltpu


def _round_up(x: int, m: int) -> int:
    return ((x + m - 1) // m) * m


def autoencoder_kernel(x_ref, w1_ref, b1_ref, w2_ref, b2_ref, o_ref):
    # Encoder: Linear + ReLU. MXU matmul with f32 accumulation; bias + ReLU in
    # f32 on the accumulator (VPU), correct/fast on all generations.
    h = jnp.dot(x_ref[...], w1_ref[...], preferred_element_type=jnp.float32)
    h = jnp.maximum(h + b1_ref[...], 0.0)          # broadcast [1,H] over [TB,H]
    # Decoder: Linear. Cast h to the weight dtype only for the MXU feed
    # (no-op for f32 weights; would drop to bf16 if bf16 weights were supplied).
    y = jnp.dot(h.astype(w2_ref.dtype), w2_ref[...],
                preferred_element_type=jnp.float32)
    o_ref[...] = (y + b2_ref[...]).astype(o_ref.dtype)


def autoencoder_forward(x, w1, b1, w2, b2, *, block_b: int = 512):
    """Fused encoder/decoder forward. x: [B, D], w1: [D, H], w2: [H, D]."""
    B, D = x.shape
    H = w1.shape[1]
    assert w1.shape == (D, H) and w2.shape == (H, D)
    assert b1.shape == (H,) and b2.shape == (D,)

    # Only the batch dim is tiled/padded. Feature dims stay unpadded: their
    # BlockSpec dims equal the full array extent, which is exempt from the
    # (8, 128) divisibility rule, and keeps x/out HBM traffic minimal.
    tb = max(8, min(_round_up(block_b, 8), _round_up(B, 8)))
    B_pad = _round_up(B, tb)
    x_p = x if B_pad == B else jnp.pad(x, ((0, B_pad - B), (0, 0)))
    b1_2d = b1.reshape(1, H)
    b2_2d = b2.reshape(1, D)
    grid = (B_pad // tb,)

    x_itemsize = jnp.dtype(x.dtype).itemsize
    w_itemsize = jnp.dtype(w1.dtype).itemsize
    weight_bytes = (w1.size + w2.size) * w_itemsize
    bias_bytes = (b1.size + b2.size) * w_itemsize

    # Single-buffer the (constant-index) weights once they get big, so the
    # default double-buffering doesn't double their VMEM footprint.
    buffer_weights_once = weight_bytes > (8 << 20)

    def const_spec(shape):
        if buffer_weights_once:
            return pl.BlockSpec(shape, lambda i: (0, 0),
                                pipeline_mode=pl.Buffered(1))
        return pl.BlockSpec(shape, lambda i: (0, 0))

    # Right-sized VMEM budget: resident weights/biases (x1 or x2 for
    # buffering) + double-buffered x and out tiles + compiler-scratch headroom.
    w_factor = 1 if buffer_weights_once else 2
    tile_bytes = tb * D * x_itemsize
    vmem_needed = (w_factor * (weight_bytes + bias_bytes)
                   + 2 * 2 * tile_bytes        # 2 streams (x, out) double-buffered
                   + (4 << 20))                # headroom for compiler scratch
    vmem_limit = int(max(vmem_needed, 8 << 20))

    # Advisory cost: real (unpadded) D/H flops; weights/biases read once.
    cost = pl.CostEstimate(
        flops=2 * B_pad * (D * H + H * D),
        transcendentals=0,
        bytes_accessed=(x_itemsize * (x_p.size + B_pad * D)
                        + w_itemsize * (w1.size + w2.size + b1.size + b2.size)),
    )

    out = pl.pallas_call(
        autoencoder_kernel,
        out_shape=jax.ShapeDtypeStruct((B_pad, D), x.dtype),
        grid_spec=pltpu.PrefetchScalarGridSpec(
            num_scalar_prefetch=0,
            grid=grid,
            in_specs=[
                # x: tiled over batch, streamed/pipelined per grid step.
                pl.BlockSpec((tb, D), lambda i: (i, 0)),
                # Weights / biases: constant block index -> VMEM-resident.
                const_spec((D, H)),
                const_spec((1, H)),
                const_spec((H, D)),
                const_spec((1, D)),
            ],
            out_specs=pl.BlockSpec((tb, D), lambda i: (i, 0)),
        ),
        compiler_params=pltpu.CompilerParams(
            # Independent batch tiles -> megacore-shardable (2 TCs on v7x);
            # demo grid length is 4 (even) so both cores get equal work.
            dimension_semantics=("parallel",),
            vmem_limit_bytes=vmem_limit,
        ),
        cost_estimate=cost,
    )(x_p, w1, b1_2d, w2, b2_2d)

    return out if B_pad == B else out[:B]


def reference_forward(x, w1, b1, w2, b2):
    h = jnp.maximum(x @ w1 + b1, 0.0)
    return h @ w2 + b2


if __name__ == "__main__":
    # Dense-autoencoder demo shapes: batch sized so the grid has 4 tiles at the
    # default batch tile of 512 (exercises pipelining + even megacore split).
    B, D, H = 2048, 64, 32
    key = jax.random.PRNGKey(0)
    kx, k1, k2, k3, k4 = jax.random.split(key, 5)

    x = jax.random.normal(kx, (B, D), dtype=jnp.float32)

    # PyTorch-style Linear init: U(-1/sqrt(fan_in), 1/sqrt(fan_in))
    lim1 = 1.0 / (D ** 0.5)
    lim2 = 1.0 / (H ** 0.5)
    w1 = jax.random.uniform(k1, (D, H), minval=-lim1, maxval=lim1, dtype=jnp.float32)
    b1 = jax.random.uniform(k2, (H,),   minval=-lim1, maxval=lim1, dtype=jnp.float32)
    w2 = jax.random.uniform(k3, (H, D), minval=-lim2, maxval=lim2, dtype=jnp.float32)
    b2 = jax.random.uniform(k4, (D,),   minval=-lim2, maxval=lim2, dtype=jnp.float32)

    out = autoencoder_forward(x, w1, b1, w2, b2, block_b=512)
    out = jax.block_until_ready(out)

    ref = reference_forward(x, w1, b1, w2, b2)
    assert out.shape == (B, D)
    assert jnp.allclose(out, ref, atol=1e-5, rtol=1e-5), "mismatch vs JAX reference"

    print("KERNEL_OK")
</pallas_src>

<mosaic_0001>
module attributes {stable_mosaic.version = 11 : i64} {
  func.func @autoencoder_kernel(%arg0: i32, %arg1: memref<512x64xf32, #tpu.memory_space<vmem>>, %arg2: memref<64x32xf32, #tpu.memory_space<vmem>>, %arg3: memref<1x32xf32, #tpu.memory_space<vmem>>, %arg4: memref<32x64xf32, #tpu.memory_space<vmem>>, %arg5: memref<1x64xf32, #tpu.memory_space<vmem>>, %arg6: memref<512x64xf32, #tpu.memory_space<vmem>>) attributes {dimension_semantics = [#tpu.dimension_semantics<parallel>], iteration_bounds = array<i64: 4>, scalar_prefetch = 0 : i64, scratch_operands = 0 : i64, tpu.core_type = #tpu.core_type<tc>, window_params = [{transform_indices = @transform_0, window_bounds = array<i64: 512, 64>}, {pipeline_mode = #tpu.pipeline_mode<synchronous>, transform_indices = @transform_1, window_bounds = array<i64: 64, 32>}, {pipeline_mode = #tpu.pipeline_mode<synchronous>, transform_indices = @transform_2, window_bounds = array<i64: 1, 32>}, {pipeline_mode = #tpu.pipeline_mode<synchronous>, transform_indices = @transform_3, window_bounds = array<i64: 32, 64>}, {pipeline_mode = #tpu.pipeline_mode<synchronous>, transform_indices = @transform_4, window_bounds = array<i64: 1, 64>}, {transform_indices = @transform_5, window_bounds = array<i64: 512, 64>}]} {
    %c0 = arith.constant 0 : index
    %c0_0 = arith.constant 0 : index
    %0 = vector.load %arg1[%c0, %c0_0] : memref<512x64xf32, #tpu.memory_space<vmem>>, vector<512x64xf32>
    %c0_1 = arith.constant 0 : index
    %c0_2 = arith.constant 0 : index
    %1 = vector.load %arg2[%c0_1, %c0_2] : memref<64x32xf32, #tpu.memory_space<vmem>>, vector<64x32xf32>
    %cst = arith.constant dense<0.000000e+00> : vector<512x32xf32>
    %2 = tpu.matmul %0, %1, %cst {dimension_numbers = #tpu.dot_dimension_numbers<[1], [0], [0], [1], [0, 0, 1, 1], [], []>} : vector<512x64xf32>, vector<64x32xf32>, vector<512x32xf32> -> vector<512x32xf32>
    %c0_3 = arith.constant 0 : index
    %c0_4 = arith.constant 0 : index
    %3 = vector.load %arg3[%c0_3, %c0_4] : memref<1x32xf32, #tpu.memory_space<vmem>>, vector<1x32xf32>
    %4 = vector.broadcast %3 : vector<1x32xf32> to vector<512x32xf32>
    %5 = arith.addf %2, %4 : vector<512x32xf32>
    %cst_5 = arith.constant 0.000000e+00 : f32
    %6 = vector.broadcast %cst_5 : f32 to vector<512x32xf32>
    %7 = arith.maximumf %5, %6 : vector<512x32xf32>
    %c0_6 = arith.constant 0 : index
    %c0_7 = arith.constant 0 : index
    %8 = vector.load %arg4[%c0_6, %c0_7] : memref<32x64xf32, #tpu.memory_space<vmem>>, vector<32x64xf32>
    %cst_8 = arith.constant dense<0.000000e+00> : vector<512x64xf32>
    %9 = tpu.matmul %7, %8, %cst_8 {dimension_numbers = #tpu.dot_dimension_numbers<[1], [0], [0], [1], [0, 0, 1, 1], [], []>} : vector<512x32xf32>, vector<32x64xf32>, vector<512x64xf32> -> vector<512x64xf32>
    %c0_9 = arith.constant 0 : index
    %c0_10 = arith.constant 0 : index
    %10 = vector.load %arg5[%c0_9, %c0_10] : memref<1x64xf32, #tpu.memory_space<vmem>>, vector<1x64xf32>
    %11 = vector.broadcast %10 : vector<1x64xf32> to vector<512x64xf32>
    %12 = arith.addf %9, %11 : vector<512x64xf32>
    %c0_11 = arith.constant 0 : index
    %c0_12 = arith.constant 0 : index
    %13 = vector.load %arg6[%c0_11, %c0_12] : memref<512x64xf32, #tpu.memory_space<vmem>>, vector<512x64xf32>
    tpu.vector_store %arg6[%c0_11, %c0_12], %12 {strides = array<i32>} : memref<512x64xf32, #tpu.memory_space<vmem>>, vector<512x64xf32>,
    return
  }
  func.func @transform_0(%arg0: i32) -> (i32, i32) {
    %c0_i32 = arith.constant 0 : i32
    %c0_i32_0 = arith.constant 0 : i32
    return %arg0, %c0_i32 : i32, i32
  }
  func.func @transform_1(%arg0: i32) -> (i32, i32) {
    %c0_i32 = arith.constant 0 : i32
    %c0_i32_0 = arith.constant 0 : i32
    %c0_i32_1 = arith.constant 0 : i32
    return %c0_i32, %c0_i32_0 : i32, i32
  }
  func.func @transform_2(%arg0: i32) -> (i32, i32) {
    %c0_i32 = arith.constant 0 : i32
    %c0_i32_0 = arith.constant 0 : i32
    %c0_i32_1 = arith.constant 0 : i32
    return %c0_i32, %c0_i32_0 : i32, i32
  }
  func.func @transform_3(%arg0: i32) -> (i32, i32) {
    %c0_i32 = arith.constant 0 : i32
    %c0_i32_0 = arith.constant 0 : i32
    %c0_i32_1 = arith.constant 0 : i32
    return %c0_i32, %c0_i32_0 : i32, i32
  }
  func.func @transform_4(%arg0: i32) -> (i32, i32) {
    %c0_i32 = arith.constant 0 : i32
    %c0_i32_0 = arith.constant 0 : i32
    %c0_i32_1 = arith.constant 0 : i32
    return %c0_i32, %c0_i32_0 : i32, i32
  }
  func.func @transform_5(%arg0: i32) -> (i32, i32) {
    %c0_i32 = arith.constant 0 : i32
    %c0_i32_0 = arith.constant 0 : i32
    return %arg0, %c0_i32 : i32, i32
  }
}

</mosaic_0001>

<bundles_post_ra>
// kernel: tpu_custom_call.1
= control target key start
LH: loop header
LB: loop body
LE: loop exit
PB: predicated region body
PF: predicated region fallthrough
CT: control target
= control target key end

     0   :  { %s1499_s18 = smov 0   ;;  %s2024_s0 = inlined_call_operand.vmem [shape: f32[2048,64], index: 0, kind: input, shape index: {}]   ;;  %s2025_s1 = inlined_call_operand.vmem [shape: f32[64,32], index: 1, kind: input, shape index: {}]   ;;  %s2026_s2 = inlined_call_operand.vmem [shape: f32[1,32], index: 2, kind: input, shape index: {}]   ;;  %s2027_s3 = inlined_call_operand.vmem [shape: f32[32,64], index: 3, kind: input, shape index: {}]   ;;  %s2028_s4 = inlined_call_operand.vmem [shape: f32[1,64], index: 4, kind: input, shape index: {}]   ;;  %s2029_s5 = inlined_call_operand.vmem [shape: f32[2048,64], index: 5, kind: output, shape index: {}]  }
   0x1 LB: > { %s1300_s19 = sadd.s32 4294967295, %s1467_s18   ;;  %p1304_p0 = scmp.ge.s32.totalorder %s1467_s18, 1  ;;  %s1467_s18 = sphi %s1499_s18, %s15_s18  }
   0x2   : > { %p188_p1 = scmp.lt.s32.totalorder %s1467_s18, 5 }
   0x4   : > { %p189_p2 = pnand %p1304_p0, %p188_p1 }
   0x5   : > { %s1305_s24 = sshll.u32 (!%p189_p2), %s1300_s19, 6 }
   0x6   : > { %192 = sbr.rel (%p189_p2) target bundleno = 547 (0x223), region = 40  ;;  %p217_p3 = scmp.lt.s32.totalorder (!%p189_p2), %s1305_s24, 255 }
   0xb   : > { %v299_v0 = vld [vmem:[%s2025_s1 + $0x38] sm:$0xff]  ;;  %v298_v1 = vld [vmem:[%s2025_s1 + $0x30] sm:$0xff]  ;;  %v297_v2 = vld [vmem:[%s2025_s1 + $0x28] sm:$0xff]  ;;  %s2031_s24 = smov (!%p217_p3, %s1305_s24), 255  ;;  %vm304_vm0 = vcmask 523264   ;;  %vm778_vm1 = vcmask 261120  }
   0xc   : > { %505 = vmatpush.msra.mxu0 %v299_v0  ;;  %1439 = vmatpush.msra.mxu2 %v299_v0  ;;  %v296_v3 = vld [vmem:[%s2025_s1 + $0x20] sm:$0xff]  ;;  %v295_v4 = vld [vmem:[%s2025_s1 + $0x18] sm:$0xff]  ;;  %s1306_s6 = sshll.u32 %s2031_s24, 3  ;;  %v294_v5 = vld [vmem:[%s2025_s1 + $0x10] sm:$0xff] }
   0xd   : > { %v293_v6 = vld [vmem:[%s2025_s1 + $0x8] sm:$0xff]  ;;  %s1536_s13 = scalar_lea.vmem %s2024_s0, %s1306_s6  ;;  %v292_v7 = vld [vmem:[%s2025_s1] sm:$0xff]  ;;  %v773_v32 = vld [vmem:[%s2027_s3 + $0x18] sm:$0xff]  ;;  %s1760_s8 = scalar_lea.vmem %s2029_s5, %s1306_s6 }
   0xe   : > { %506 = vmatpush.msra.mxu0 %v298_v1  ;;  %1440 = vmatpush.msra.mxu2 %v298_v1  ;;  %v228_v8 = vld [vmem:[%s1536_s13] sm:$0xff]  ;;  %v229_v10 = vld [vmem:[%s1536_s13 + $0x8] sm:$0xff]  ;;  %v230_v12 = vld [vmem:[%s1536_s13 + $0x10] sm:$0xff] }
   0xf   : > { %v260_v9 = vld [vmem:[%s1536_s13 + $0x100] sm:$0xff]  ;;  %v261_v11 = vld [vmem:[%s1536_s13 + $0x108] sm:$0xff]  ;;  %v262_v13 = vld [vmem:[%s1536_s13 + $0x110] sm:$0xff]  ;;  %983 = vmatpush.msra.mxu1 %v773_v32  ;;  %1447 = vmatpush.msra.mxu3 %v773_v32 }
  0x10   : > { %507 = vmatpush.msra.mxu0 %v297_v2  ;;  %1441 = vmatpush.msra.mxu2 %v297_v2  ;;  %v231_v14 = vld [vmem:[%s1536_s13 + $0x18] sm:$0xff]  ;;  %v232_v16 = vld [vmem:[%s1536_s13 + $0x20] sm:$0xff]  ;;  %v233_v18 = vld [vmem:[%s1536_s13 + $0x28] sm:$0xff] }
  0x11   : > { %v263_v15 = vld [vmem:[%s1536_s13 + $0x118] sm:$0xff]  ;;  %v264_v17 = vld [vmem:[%s1536_s13 + $0x120] sm:$0xff]  ;;  %v265_v19 = vld [vmem:[%s1536_s13 + $0x128] sm:$0xff] }
  0x12   : > { %508 = vmatpush.msra.mxu0 %v296_v3  ;;  %1442 = vmatpush.msra.mxu2 %v296_v3  ;;  %v234_v20 = vld [vmem:[%s1536_s13 + $0x30] sm:$0xff]  ;;  %v235_v22 = vld [vmem:[%s1536_s13 + $0x38] sm:$0xff]  ;;  %v236_v24 = vld [vmem:[%s1536_s13 + $0x40] sm:$0xff] }
  0x13   : > { %v266_v21 = vld [vmem:[%s1536_s13 + $0x130] sm:$0xff]  ;;  %v267_v23 = vld [vmem:[%s1536_s13 + $0x138] sm:$0xff]  ;;  %v268_v25 = vld [vmem:[%s1536_s13 + $0x140] sm:$0xff] }
  0x14   : > { %509 = vmatpush.msra.mxu0 %v295_v4  ;;  %1443 = vmatpush.msra.mxu2 %v295_v4  ;;  %v237_v26 = vld [vmem:[%s1536_s13 + $0x48] sm:$0xff]  ;;  %v238_v28 = vld [vmem:[%s1536_s13 + $0x50] sm:$0xff]  ;;  %v239_v30 = vld [vmem:[%s1536_s13 + $0x58] sm:$0xff] }
  0x15   : > { %v269_v27 = vld [vmem:[%s1536_s13 + $0x148] sm:$0xff]  ;;  %v270_v29 = vld [vmem:[%s1536_s13 + $0x150] sm:$0xff]  ;;  %v271_v31 = vld [vmem:[%s1536_s13 + $0x158] sm:$0xff] }
  0x16   : > { %510 = vmatpush.msra.mxu0 %v294_v5  ;;  %1444 = vmatpush.msra.mxu2 %v294_v5  ;;  %v772_v33 = vld [vmem:[%s2027_s3 + $0x10] sm:$0xff]  ;;  %v240_v34 = vld [vmem:[%s1536_s13 + $0x60] sm:$0xff]  ;;  %v771_v36 = vld [vmem:[%s2027_s3 + $0x8] sm:$0xff] }
  0x17   : > { %v272_v35 = vld [vmem:[%s1536_s13 + $0x160] sm:$0xff]  ;;  %984 = vmatpush.msra.mxu1 %v772_v33  ;;  %1448 = vmatpush.msra.mxu3 %v772_v33  ;;  %v241_v38 = vld [vmem:[%s1536_s13 + $0x68] sm:$0xff]  ;;  %v242_v40 = vld [vmem:[%s1536_s13 + $0x70] sm:$0xff] }
  0x18   : > { %511 = vmatpush.msra.mxu0 %v293_v6  ;;  %1445 = vmatpush.msra.mxu2 %v293_v6  ;;  %v770_v37 = vld [vmem:[%s2027_s3] sm:$0xff]  ;;  %v273_v39 = vld [vmem:[%s1536_s13 + $0x168] sm:$0xff]  ;;  %v274_v41 = vld [vmem:[%s1536_s13 + $0x170] sm:$0xff] }
  0x19   : > { %985 = vmatpush.msra.mxu1 %v771_v36  ;;  %1449 = vmatpush.msra.mxu3 %v771_v36  ;;  %v243_v42 = vld [vmem:[%s1536_s13 + $0x78] sm:$0xff]  ;;  %v1620_v44 = vld [vmem:[%s2026_s2] ss:$0 sm:$0xff]  ;;  %v245_v52 = vld [vmem:[%s1536_s13 + $0x88] sm:$0xff] }
  0x1a   : > { %512 = vmatpush.msra.mxu0 %v292_v7  ;;  %1446 = vmatpush.msra.mxu2 %v292_v7  ;;  %v275_v43 = vld [vmem:[%s1536_s13 + $0x178] sm:$0xff]  ;;  %v244_v46 = vld [vmem:[%s1536_s13 + $0x80] sm:$0xff]  ;;  %v277_v53 = vld [vmem:[%s1536_s13 + $0x188] sm:$0xff] }
  0x1b   : > { %1309 = vmatmul.msk.f32.vlgmr.msra.gmra.mxu0 %vm304_vm0, %v228_v8  ;;  %1341 = vmatmul.msk.f32.vlgmr.msra.gmra.mxu2 %vm304_vm0, %v260_v9  ;;  %v276_v47 = vld [vmem:[%s1536_s13 + $0x180] sm:$0xff]  ;;  %v246_v59 = vld [vmem:[%s1536_s13 + $0x90] sm:$0xff]  ;;  %v247_v3 = vld [vmem:[%s1536_s13 + $0x98] sm:$0xff] }
  0x1c   : > { %986 = vmatpush.msra.mxu1 %v770_v37  ;;  %1450 = vmatpush.msra.mxu3 %v770_v37  ;;  %v278_v60 = vld [vmem:[%s1536_s13 + $0x190] sm:$0xff]  ;;  %v279_v4 = vld [vmem:[%s1536_s13 + $0x198] sm:$0xff] }
  0x1d   : > { %v283_v36 = vld [vmem:[%s1536_s13 + $0x1b8] sm:$0xff] }
  0x23   : > { %1310 = vmatmul.msk.f32.gmra.mxu0 %vm304_vm0, %v229_v10  ;;  %1342 = vmatmul.msk.f32.gmra.mxu2 %vm304_vm0, %v261_v11  ;;  %v248_v11 = vld [vmem:[%s1536_s13 + $0xa0] sm:$0xff] }
  0x2b   : > { %1311 = vmatmul.msk.f32.gmra.mxu0 %vm304_vm0, %v230_v12  ;;  %1343 = vmatmul.msk.f32.gmra.mxu2 %vm304_vm0, %v262_v13  ;;  %v280_v12 = vld [vmem:[%s1536_s13 + $0x1a0] sm:$0xff] }
  0x33   : > { %1312 = vmatmul.msk.f32.gmra.mxu0 %vm304_vm0, %v231_v14  ;;  %1344 = vmatmul.msk.f32.gmra.mxu2 %vm304_vm0, %v263_v15 }
  0x3b   : > { %1313 = vmatmul.msk.f32.gmra.mxu0 %vm304_vm0, %v232_v16  ;;  %1345 = vmatmul.msk.f32.gmra.mxu2 %vm304_vm0, %v264_v17 }
  0x43   : > { %1314 = vmatmul.msk.f32.gmra.mxu0 %vm304_vm0, %v233_v18  ;;  %1346 = vmatmul.msk.f32.gmra.mxu2 %vm304_vm0, %v265_v19  ;;  %v249_v19 = vld [vmem:[%s1536_s13 + $0xa8] sm:$0xff] }
  0x4b   : > { %1315 = vmatmul.msk.f32.gmra.mxu0 %vm304_vm0, %v234_v20  ;;  %1347 = vmatmul.msk.f32.gmra.mxu2 %vm304_vm0, %v266_v21  ;;  %v281_v20 = vld [vmem:[%s1536_s13 + $0x1a8] sm:$0xff] }
  0x53   : > { %1316 = vmatmul.msk.f32.gmra.mxu0 %vm304_vm0, %v235_v22  ;;  %1348 = vmatmul.msk.f32.gmra.mxu2 %vm304_vm0, %v267_v23 }
  0x5b   : > { %1317 = vmatmul.msk.f32.gmra.mxu0 %vm304_vm0, %v236_v24  ;;  %1349 = vmatmul.msk.f32.gmra.mxu2 %vm304_vm0, %v268_v25 }
  0x63   : > { %1318 = vmatmul.msk.f32.gmra.mxu0 %vm304_vm0, %v237_v26  ;;  %1350 = vmatmul.msk.f32.gmra.mxu2 %vm304_vm0, %v269_v27  ;;  %v250_v27 = vld [vmem:[%s1536_s13 + $0xb0] sm:$0xff] }
  0x6b   : > { %1319 = vmatmul.msk.f32.gmra.mxu0 %vm304_vm0, %v238_v28  ;;  %1351 = vmatmul.msk.f32.gmra.mxu2 %vm304_vm0, %v270_v29  ;;  %v282_v28 = vld [vmem:[%s1536_s13 + $0x1b0] sm:$0xff] }
  0x73   : > { %1320 = vmatmul.msk.f32.gmra.mxu0 %vm304_vm0, %v239_v30  ;;  %1352 = vmatmul.msk.f32.gmra.mxu2 %vm304_vm0, %v271_v31 }
  0x7b   : > { %1321 = vmatmul.msk.f32.gmra.mxu0 %vm304_vm0, %v240_v34  ;;  %1353 = vmatmul.msk.f32.gmra.mxu2 %vm304_vm0, %v272_v35  ;;  %v251_v35 = vld [vmem:[%s1536_s13 + $0xb8] sm:$0xff] }
  0x83   : > { %1322 = vmatmul.msk.f32.gmra.mxu0 %vm304_vm0, %v241_v38  ;;  %1354 = vmatmul.msk.f32.gmra.mxu2 %vm304_vm0, %v273_v39 }
  0x8b   : > { %1323 = vmatmul.msk.f32.gmra.mxu0 %vm304_vm0, %v242_v40  ;;  %1355 = vmatmul.msk.f32.gmra.mxu2 %vm304_vm0, %v274_v41 }
  0x93   : > { %1324 = vmatmul.msk.f32.gmra.mxu0 %vm304_vm0, %v243_v42  ;;  %1356 = vmatmul.msk.f32.gmra.mxu2 %vm304_vm0, %v275_v43  ;;  %v252_v43 = vld [vmem:[%s1536_s13 + $0xc0] sm:$0xff] }
  0x98   : > { %v514_v45 = vpop.f32.mrf.mxu0 }
  0x99   : > { %v515_v48 = vadd.f32 %v1620_v44, %v514_v45  ;;  %v284_v45 = vld [vmem:[%s1536_s13 + $0x1c0] sm:$0xff] }
  0x9b   : > { %v706_v49 = vmax.f32 %v515_v48, 0.0  ;;  %1325 = vmatmul.msk.f32.gmra.mxu0 %vm304_vm0, %v244_v46  ;;  %1357 = vmatmul.msk.f32.gmra.mxu2 %vm304_vm0, %v276_v47 }
  0x9d   : > { %1373 = vmatmul.msk.f32.vlgmr.msra.gmra.mxu1 %vm778_vm1, %v706_v49 }
  0x9e   : > { %v1628_v50 = vpop.f32.mrf.mxu2 }
  0xa0   : > { %v517_v51 = vpop.f32.mrf.mxu0 }
  0xa1   : > { %v518_v54 = vadd.f32 %v1620_v44, %v517_v51 }
  0xa3   : > { %v707_v55 = vmax.f32 %v518_v54, 0.0  ;;  %1326 = vmatmul.msk.f32.gmra.mxu0 %vm304_vm0, %v245_v52  ;;  %1358 = vmatmul.msk.f32.gmra.mxu2 %vm304_vm0, %v277_v53  ;;  %v253_v53 = vld [vmem:[%s1536_s13 + $0xc8] sm:$0xff] }
  0xa4   : > { %v285_v54 = vld [vmem:[%s1536_s13 + $0x1c8] sm:$0xff] }
  0xa5   : > { %1374 = vmatmul.msk.f32.gmra.mxu1 %vm778_vm1, %v707_v55 }
  0xa6   : > { %v613_v56 = vpop.f32.mrf.mxu2 }
  0xa7   : > { %v614_v57 = vadd.f32 %v1620_v44, %v613_v56 }
  0xa8   : > { %v520_v58 = vpop.f32.mrf.mxu0 }
  0xa9   : > { %v739_v61 = vmax.f32 %v614_v57, 0.0  ;;  %v521_v62 = vadd.f32 %v1620_v44, %v520_v58 }
  0xab   : > { %v708_v63 = vmax.f32 %v521_v62, 0.0  ;;  %1327 = vmatmul.msk.f32.gmra.mxu0 %vm304_vm0, %v246_v59  ;;  %1359 = vmatmul.msk.f32.gmra.mxu2 %vm304_vm0, %v278_v60  ;;  %v286_v62 = vld [vmem:[%s1536_s13 + $0x1d0] sm:$0xff] }
  0xac   : > { %1406 = vmatmul.msk.f32.vlgmr.msra.gmra.mxu3 %vm778_vm1, %v739_v61  ;;  %v254_v61 = vld [vmem:[%s1536_s13 + $0xd0] sm:$0xff] }
  0xad   : > { %1375 = vmatmul.msk.f32.gmra.mxu1 %vm778_vm1, %v708_v63 }
  0xae   : > { %v616_v0 = vpop.f32.mrf.mxu2 }
  0xaf   : > { %v617_v1 = vadd.f32 %v1620_v44, %v616_v0 }
  0xb0   : > { %v523_v2 = vpop.f32.mrf.mxu0 }
  0xb1   : > { %v740_v5 = vmax.f32 %v617_v1, 0.0  ;;  %v524_v6 = vadd.f32 %v1620_v44, %v523_v2 }
  0xb3   : > { %v709_v7 = vmax.f32 %v524_v6, 0.0  ;;  %1328 = vmatmul.msk.f32.gmra.mxu0 %vm304_vm0, %v247_v3  ;;  %1360 = vmatmul.msk.f32.gmra.mxu2 %vm304_vm0, %v279_v4  ;;  %v287_v6 = vld [vmem:[%s1536_s13 + $0x1d8] sm:$0xff] }
  0xb4   : > { %1407 = vmatmul.msk.f32.gmra.mxu3 %vm778_vm1, %v740_v5  ;;  %v255_v5 = vld [vmem:[%s1536_s13 + $0xd8] sm:$0xff] }
  0xb5   : > { %1376 = vmatmul.msk.f32.gmra.mxu1 %vm778_vm1, %v709_v7 }
  0xb6   : > { %v619_v8 = vpop.f32.mrf.mxu2 }
  0xb7   : > { %v620_v9 = vadd.f32 %v1620_v44, %v619_v8 }
  0xb8   : > { %v526_v10 = vpop.f32.mrf.mxu0 }
  0xb9   : > { %v741_v13 = vmax.f32 %v620_v9, 0.0  ;;  %v527_v14 = vadd.f32 %v1620_v44, %v526_v10 }
  0xbb   : > { %v710_v15 = vmax.f32 %v527_v14, 0.0  ;;  %1329 = vmatmul.msk.f32.gmra.mxu0 %vm304_vm0, %v248_v11  ;;  %1361 = vmatmul.msk.f32.gmra.mxu2 %vm304_vm0, %v280_v12  ;;  %v288_v14 = vld [vmem:[%s1536_s13 + $0x1e0] sm:$0xff] }
  0xbc   : > { %1408 = vmatmul.msk.f32.gmra.mxu3 %vm778_vm1, %v741_v13  ;;  %v256_v13 = vld [vmem:[%s1536_s13 + $0xe0] sm:$0xff] }
  0xbd   : > { %1377 = vmatmul.msk.f32.gmra.mxu1 %vm778_vm1, %v710_v15 }
  0xbe   : > { %v622_v16 = vpop.f32.mrf.mxu2 }
  0xbf   : > { %v623_v17 = vadd.f32 %v1620_v44, %v622_v16 }
  0xc0   : > { %v529_v18 = vpop.f32.mrf.mxu0 }
  0xc1   : > { %v742_v21 = vmax.f32 %v623_v17, 0.0  ;;  %v530_v22 = vadd.f32 %v1620_v44, %v529_v18 }
  0xc3   : > { %v711_v23 = vmax.f32 %v530_v22, 0.0  ;;  %1330 = vmatmul.msk.f32.gmra.mxu0 %vm304_vm0, %v249_v19  ;;  %1362 = vmatmul.msk.f32.gmra.mxu2 %vm304_vm0, %v281_v20  ;;  %v289_v22 = vld [vmem:[%s1536_s13 + $0x1e8] sm:$0xff] }
  0xc4   : > { %1409 = vmatmul.msk.f32.gmra.mxu3 %vm778_vm1, %v742_v21  ;;  %v257_v21 = vld [vmem:[%s1536_s13 + $0xe8] sm:$0xff] }
  0xc5   : > { %1378 = vmatmul.msk.f32.gmra.mxu1 %vm778_vm1, %v711_v23 }
  0xc6   : > { %v625_v24 = vpop.f32.mrf.mxu2 }
  0xc7   : > { %v626_v25 = vadd.f32 %v1620_v44, %v625_v24 }
  0xc8   : > { %v532_v26 = vpop.f32.mrf.mxu0 }
  0xc9   : > { %v743_v29 = vmax.f32 %v626_v25, 0.0  ;;  %v533_v30 = vadd.f32 %v1620_v44, %v532_v26 }
  0xcb   : > { %v712_v31 = vmax.f32 %v533_v30, 0.0  ;;  %1331 = vmatmul.msk.f32.gmra.mxu0 %vm304_vm0, %v250_v27  ;;  %1363 = vmatmul.msk.f32.gmra.mxu2 %vm304_vm0, %v282_v28  ;;  %v290_v30 = vld [vmem:[%s1536_s13 + $0x1f0] sm:$0xff] }
  0xcc   : > { %1410 = vmatmul.msk.f32.gmra.mxu3 %vm778_vm1, %v743_v29  ;;  %v258_v29 = vld [vmem:[%s1536_s13 + $0xf0] sm:$0xff] }
  0xcd   : > { %1379 = vmatmul.msk.f32.gmra.mxu1 %vm778_vm1, %v712_v31 }
  0xce   : > { %v628_v32 = vpop.f32.mrf.mxu2 }
  0xcf   : > { %v629_v33 = vadd.f32 %v1620_v44, %v628_v32 }
  0xd0   : > { %v535_v34 = vpop.f32.mrf.mxu0 }
  0xd1   : > { %v744_v37 = vmax.f32 %v629_v33, 0.0  ;;  %v536_v38 = vadd.f32 %v1620_v44, %v535_v34 }
  0xd3   : > { %v713_v39 = vmax.f32 %v536_v38, 0.0  ;;  %1332 = vmatmul.msk.f32.gmra.mxu0 %vm304_vm0, %v251_v35  ;;  %1364 = vmatmul.msk.f32.gmra.mxu2 %vm304_vm0, %v283_v36  ;;  %v291_v38 = vld [vmem:[%s1536_s13 + $0x1f8] sm:$0xff] }
  0xd4   : > { %1411 = vmatmul.msk.f32.gmra.mxu3 %vm778_vm1, %v744_v37  ;;  %v259_v37 = vld [vmem:[%s1536_s13 + $0xf8] sm:$0xff] }
  0xd5   : > { %1380 = vmatmul.msk.f32.gmra.mxu1 %vm778_vm1, %v713_v39 }
  0xd6   : > { %v631_v40 = vpop.f32.mrf.mxu2 }
  0xd7   : > { %v632_v41 = vadd.f32 %v1620_v44, %v631_v40 }
  0xd8   : > { %v538_v42 = vpop.f32.mrf.mxu0 }
  0xd9   : > { %v745_v46 = vmax.f32 %v632_v41, 0.0  ;;  %v539_v47 = vadd.f32 %v1620_v44, %v538_v42 }
  0xdb   : > { %v714_v48 = vmax.f32 %v539_v47, 0.0  ;;  %1333 = vmatmul.msk.f32.gmra.mxu0 %vm304_vm0, %v252_v43  ;;  %1365 = vmatmul.msk.f32.gmra.mxu2 %vm304_vm0, %v284_v45  ;;  %v1752_v45 = vld [vmem:[%s2028_s4] ss:$0 sm:$0xff] }
  0xdc   : > { %1412 = vmatmul.msk.f32.gmra.mxu3 %vm778_vm1, %v745_v46 }
  0xdd   : > { %1381 = vmatmul.msk.f32.gmra.mxu1 %vm778_vm1, %v714_v48 }
  0xde   : > { %v634_v49 = vpop.f32.mrf.mxu2 }
  0xdf   : > { %v635_v51 = vadd.f32 %v1620_v44, %v634_v49 }
  0xe0   : > { %v541_v52 = vpop.f32.mrf.mxu0 }
  0xe1   : > { %v746_v55 = vmax.f32 %v635_v51, 0.0  ;;  %v542_v56 = vadd.f32 %v1620_v44, %v541_v52 }
  0xe3   : > { %v715_v57 = vmax.f32 %v542_v56, 0.0  ;;  %1334 = vmatmul.msk.f32.gmra.mxu0 %vm304_vm0, %v253_v53  ;;  %1366 = vmatmul.msk.f32.gmra.mxu2 %vm304_vm0, %v285_v54 }
  0xe4   : > { %1413 = vmatmul.msk.f32.gmra.mxu3 %vm778_vm1, %v746_v55 }
  0xe5   : > { %1382 = vmatmul.msk.f32.gmra.mxu1 %vm778_vm1, %v715_v57 }
  0xe6   : > { %v637_v58 = vpop.f32.mrf.mxu2 }
  0xe7   : > { %v638_v59 = vadd.f32 %v1620_v44, %v637_v58 }
  0xe8   : > { %v544_v60 = vpop.f32.mrf.mxu0 }
  0xe9   : > { %v747_v63 = vmax.f32 %v638_v59, 0.0  ;;  %v545_v0 = vadd.f32 %v1620_v44, %v544_v60 }
  0xeb   : > { %v716_v1 = vmax.f32 %v545_v0, 0.0  ;;  %1335 = vmatmul.msk.f32.gmra.mxu0 %vm304_vm0, %v254_v61  ;;  %1367 = vmatmul.msk.f32.gmra.mxu2 %vm304_vm0, %v286_v62 }
  0xec   : > { %1414 = vmatmul.msk.f32.gmra.mxu3 %vm778_vm1, %v747_v63 }
  0xed   : > { %1383 = vmatmul.msk.f32.gmra.mxu1 %vm778_vm1, %v716_v1 }
  0xee   : > { %v640_v2 = vpop.f32.mrf.mxu2 }
  0xef   : > { %v641_v3 = vadd.f32 %v1620_v44, %v640_v2 }
  0xf0   : > { %v547_v4 = vpop.f32.mrf.mxu0 }
  0xf1   : > { %v748_v7 = vmax.f32 %v641_v3, 0.0  ;;  %v548_v8 = vadd.f32 %v1620_v44, %v547_v4 }
  0xf3   : > { %v717_v9 = vmax.f32 %v548_v8, 0.0  ;;  %1336 = vmatmul.msk.f32.gmra.mxu0 %vm304_vm0, %v255_v5  ;;  %1368 = vmatmul.msk.f32.gmra.mxu2 %vm304_vm0, %v287_v6 }
  0xf4   : > { %1415 = vmatmul.msk.f32.gmra.mxu3 %vm778_vm1, %v748_v7 }
  0xf5   : > { %1384 = vmatmul.msk.f32.gmra.mxu1 %vm778_vm1, %v717_v9 }
  0xf6   : > { %v643_v10 = vpop.f32.mrf.mxu2 }
  0xf7   : > { %v644_v11 = vadd.f32 %v1620_v44, %v643_v10 }
  0xf8   : > { %v550_v12 = vpop.f32.mrf.mxu0 }
  0xf9   : > { %v749_v15 = vmax.f32 %v644_v11, 0.0  ;;  %v551_v16 = vadd.f32 %v1620_v44, %v550_v12 }
  0xfb   : > { %v718_v17 = vmax.f32 %v551_v16, 0.0  ;;  %1337 = vmatmul.msk.f32.gmra.mxu0 %vm304_vm0, %v256_v13  ;;  %1369 = vmatmul.msk.f32.gmra.mxu2 %vm304_vm0, %v288_v14 }
  0xfc   : > { %1416 = vmatmul.msk.f32.gmra.mxu3 %vm778_vm1, %v749_v15 }
  0xfd   : > { %1385 = vmatmul.msk.f32.gmra.mxu1 %vm778_vm1, %v718_v17 }
  0xfe   : > { %v646_v18 = vpop.f32.mrf.mxu2 }
  0xff   : > { %v647_v19 = vadd.f32 %v1620_v44, %v646_v18 }
 0x100   : > { %v553_v20 = vpop.f32.mrf.mxu0 }
 0x101   : > { %v750_v23 = vmax.f32 %v647_v19, 0.0  ;;  %v554_v24 = vadd.f32 %v1620_v44, %v553_v20 }
 0x103   : > { %v719_v25 = vmax.f32 %v554_v24, 0.0  ;;  %1338 = vmatmul.msk.f32.gmra.mxu0 %vm304_vm0, %v257_v21  ;;  %1370 = vmatmul.msk.f32.gmra.mxu2 %vm304_vm0, %v289_v22 }
 0x104   : > { %1417 = vmatmul.msk.f32.gmra.mxu3 %vm778_vm1, %v750_v23 }
 0x105   : > { %1386 = vmatmul.msk.f32.gmra.mxu1 %vm778_vm1, %v719_v25 }
 0x106   : > { %v649_v26 = vpop.f32.mrf.mxu2 }
 0x107   : > { %v650_v27 = vadd.f32 %v1620_v44, %v649_v26 }
 0x108   : > { %v556_v28 = vpop.f32.mrf.mxu0 }
 0x109   : > { %v751_v31 = vmax.f32 %v650_v27, 0.0  ;;  %v557_v32 = vadd.f32 %v1620_v44, %v556_v28 }
 0x10b   : > { %v720_v33 = vmax.f32 %v557_v32, 0.0  ;;  %1339 = vmatmul.msk.f32.gmra.mxu0 %vm304_vm0, %v258_v29  ;;  %1371 = vmatmul.msk.f32.gmra.mxu2 %vm304_vm0, %v290_v30 }
 0x10c   : > { %1418 = vmatmul.msk.f32.gmra.mxu3 %vm778_vm1, %v751_v31 }
 0x10d   : > { %1387 = vmatmul.msk.f32.gmra.mxu1 %vm778_vm1, %v720_v33 }
 0x10e   : > { %v652_v34 = vpop.f32.mrf.mxu2 }
 0x10f   : > { %v653_v35 = vadd.f32 %v1620_v44, %v652_v34 }
 0x110   : > { %v559_v36 = vpop.f32.mrf.mxu0 }
 0x111   : > { %v752_v39 = vmax.f32 %v653_v35, 0.0  ;;  %v560_v40 = vadd.f32 %v1620_v44, %v559_v36 }
 0x113   : > { %v721_v41 = vmax.f32 %v560_v40, 0.0  ;;  %1340 = vmatmul.msk.f32.gmra.mxu0 %vm304_vm0, %v259_v37  ;;  %1372 = vmatmul.msk.f32.gmra.mxu2 %vm304_vm0, %v291_v38 }
 0x114   : > { %1419 = vmatmul.msk.f32.gmra.mxu3 %vm778_vm1, %v752_v39 }
 0x115   : > { %1388 = vmatmul.msk.f32.gmra.mxu1 %vm778_vm1, %v721_v41 }
 0x116   : > { %v655_v42 = vpop.f32.mrf.mxu2 }
 0x117   : > { %v656_v43 = vadd.f32 %v1620_v44, %v655_v42 }
 0x118   : > { %v562_v46 = vpop.f32.mrf.mxu0 }
 0x119   : > { %v753_v47 = vmax.f32 %v656_v43, 0.0  ;;  %v563_v48 = vadd.f32 %v1620_v44, %v562_v46 }
 0x11a   : > { %v988_v49 = vpop.f32.mrf.mxu1 }
 0x11b   : > { %v722_v51 = vmax.f32 %v563_v48, 0.0  ;;  %v989_v52 = vadd.f32 %v1752_v45, %v988_v49 }
 0x11c   : > { %1420 = vmatmul.msk.f32.gmra.mxu3 %vm778_vm1, %v753_v47 }
 0x11d   : > { %1180 = vst.msk [vmem:[%s1760_s8] sm:$0xff] %vm304_vm0, %v989_v52  ;;  %1389 = vmatmul.msk.f32.gmra.mxu1 %vm778_vm1, %v722_v51 }
 0x11e   : > { %v658_v53 = vpop.f32.mrf.mxu2 }
 0x11f   : > { %v659_v54 = vadd.f32 %v1620_v44, %v658_v53 }
 0x120   : > { %v565_v55 = vpop.f32.mrf.mxu0 }
 0x121   : > { %v754_v56 = vmax.f32 %v659_v54, 0.0  ;;  %v566_v57 = vadd.f32 %v1620_v44, %v565_v55 }
 0x122   : > { %v991_v58 = vpop.f32.mrf.mxu1 }
 0x123   : > { %v723_v59 = vmax.f32 %v566_v57, 0.0  ;;  %v992_v60 = vadd.f32 %v1752_v45, %v991_v58 }
 0x124   : > { %1421 = vmatmul.msk.f32.gmra.mxu3 %vm778_vm1, %v754_v56 }
 0x125   : > { %1181 = vst.msk [vmem:[%s1760_s8 + $0x8] sm:$0xff] %vm304_vm0, %v992_v60  ;;  %1390 = vmatmul.msk.f32.gmra.mxu1 %vm778_vm1, %v723_v59 }
 0x126   : > { %v661_v61 = vpop.f32.mrf.mxu2 }
 0x127   : > { %v662_v62 = vadd.f32 %v1620_v44, %v661_v61 }
 0x128   : > { %v568_v63 = vpop.f32.mrf.mxu0 }
 0x129   : > { %v755_v0 = vmax.f32 %v662_v62, 0.0  ;;  %v569_v1 = vadd.f32 %v1620_v44, %v568_v63 }
 0x12a   : > { %v994_v2 = vpop.f32.mrf.mxu1 }
 0x12b   : > { %v724_v3 = vmax.f32 %v569_v1, 0.0  ;;  %v995_v4 = vadd.f32 %v1752_v45, %v994_v2 }
 0x12c   : > { %1422 = vmatmul.msk.f32.gmra.mxu3 %vm778_vm1, %v755_v0 }
 0x12d   : > { %1182 = vst.msk [vmem:[%s1760_s8 + $0x10] sm:$0xff] %vm304_vm0, %v995_v4  ;;  %1391 = vmatmul.msk.f32.gmra.mxu1 %vm778_vm1, %v724_v3 }
 0x12e   : > { %v664_v5 = vpop.f32.mrf.mxu2 }
 0x12f   : > { %v665_v6 = vadd.f32 %v1620_v44, %v664_v5  ;;  %v1087_v7 = vpop.f32.mrf.mxu3 }
 0x130   : > { %v1088_v8 = vadd.f32 %v1752_v45, %v1087_v7  ;;  %v571_v9 = vpop.f32.mrf.mxu0 }
 0x131   : > { %v756_v10 = vmax.f32 %v665_v6, 0.0  ;;  %v572_v11 = vadd.f32 %v1620_v44, %v571_v9 }
 0x132   : > { %1213 = vst.msk [vmem:[%s1760_s8 + $0x108] sm:$0xff] %vm304_vm0, %v1088_v8  ;;  %v997_v12 = vpop.f32.mrf.mxu1 }
 0x133   : > { %v725_v13 = vmax.f32 %v572_v11, 0.0  ;;  %v998_v14 = vadd.f32 %v1752_v45, %v997_v12 }
 0x134   : > { %1423 = vmatmul.msk.f32.gmra.mxu3 %vm778_vm1, %v756_v10 }
 0x135   : > { %1183 = vst.msk [vmem:[%s1760_s8 + $0x18] sm:$0xff] %vm304_vm0, %v998_v14  ;;  %1392 = vmatmul.msk.f32.gmra.mxu1 %vm778_vm1, %v725_v13 }
 0x136   : > { %v667_v15 = vpop.f32.mrf.mxu2 }
 0x137   : > { %v668_v16 = vadd.f32 %v1620_v44, %v667_v15  ;;  %v1090_v17 = vpop.f32.mrf.mxu3 }
 0x138   : > { %v1091_v18 = vadd.f32 %v1752_v45, %v1090_v17  ;;  %v574_v19 = vpop.f32.mrf.mxu0 }
 0x139   : > { %v757_v20 = vmax.f32 %v668_v16, 0.0  ;;  %v575_v21 = vadd.f32 %v1620_v44, %v574_v19 }
 0x13a   : > { %1214 = vst.msk [vmem:[%s1760_s8 + $0x110] sm:$0xff] %vm304_vm0, %v1091_v18  ;;  %v1000_v22 = vpop.f32.mrf.mxu1 }
 0x13b   : > { %v726_v23 = vmax.f32 %v575_v21, 0.0  ;;  %v1001_v24 = vadd.f32 %v1752_v45, %v1000_v22 }
 0x13c   : > { %1424 = vmatmul.msk.f32.gmra.mxu3 %vm778_vm1, %v757_v20 }
 0x13d   : > { %1184 = vst.msk [vmem:[%s1760_s8 + $0x20] sm:$0xff] %vm304_vm0, %v1001_v24  ;;  %1393 = vmatmul.msk.f32.gmra.mxu1 %vm778_vm1, %v726_v23 }
 0x13e   : > { %v670_v25 = vpop.f32.mrf.mxu2 }
 0x13f   : > { %v671_v26 = vadd.f32 %v1620_v44, %v670_v25  ;;  %v1093_v27 = vpop.f32.mrf.mxu3 }
 0x140   : > { %v1094_v28 = vadd.f32 %v1752_v45, %v1093_v27  ;;  %v577_v29 = vpop.f32.mrf.mxu0 }
 0x141   : > { %v758_v30 = vmax.f32 %v671_v26, 0.0  ;;  %v578_v31 = vadd.f32 %v1620_v44, %v577_v29 }
 0x142   : > { %1215 = vst.msk [vmem:[%s1760_s8 + $0x118] sm:$0xff] %vm304_vm0, %v1094_v28  ;;  %v1003_v32 = vpop.f32.mrf.mxu1 }
 0x143   : > { %v727_v33 = vmax.f32 %v578_v31, 0.0  ;;  %v1004_v34 = vadd.f32 %v1752_v45, %v1003_v32 }
 0x144   : > { %1425 = vmatmul.msk.f32.gmra.mxu3 %vm778_vm1, %v758_v30 }
 0x145   : > { %1185 = vst.msk [vmem:[%s1760_s8 + $0x28] sm:$0xff] %vm304_vm0, %v1004_v34  ;;  %1394 = vmatmul.msk.f32.gmra.mxu1 %vm778_vm1, %v727_v33 }
 0x146   : > { %v673_v35 = vpop.f32.mrf.mxu2 }
 0x147   : > { %v674_v36 = vadd.f32 %v1620_v44, %v673_v35  ;;  %v1096_v37 = vpop.f32.mrf.mxu3 }
 0x148   : > { %v1097_v38 = vadd.f32 %v1752_v45, %v1096_v37  ;;  %v580_v39 = vpop.f32.mrf.mxu0 }
 0x149   : > { %v759_v40 = vmax.f32 %v674_v36, 0.0  ;;  %v581_v41 = vadd.f32 %v1620_v44, %v580_v39 }
 0x14a   : > { %1216 = vst.msk [vmem:[%s1760_s8 + $0x120] sm:$0xff] %vm304_vm0, %v1097_v38  ;;  %v1006_v42 = vpop.f32.mrf.mxu1 }
 0x14b   : > { %v728_v43 = vmax.f32 %v581_v41, 0.0  ;;  %v1007_v46 = vadd.f32 %v1752_v45, %v1006_v42 }
 0x14c   : > { %1426 = vmatmul.msk.f32.gmra.mxu3 %vm778_vm1, %v759_v40 }
 0x14d   : > { %1186 = vst.msk [vmem:[%s1760_s8 + $0x30] sm:$0xff] %vm304_vm0, %v1007_v46  ;;  %1395 = vmatmul.msk.f32.gmra.mxu1 %vm778_vm1, %v728_v43 }
 0x14e   : > { %v676_v47 = vpop.f32.mrf.mxu2 }
 0x14f   : > { %v677_v48 = vadd.f32 %v1620_v44, %v676_v47  ;;  %v1099_v49 = vpop.f32.mrf.mxu3 }
 0x150   : > { %v1100_v51 = vadd.f32 %v1752_v45, %v1099_v49  ;;  %v583_v52 = vpop.f32.mrf.mxu0 }
 0x151   : > { %v760_v53 = vmax.f32 %v677_v48, 0.0  ;;  %v584_v54 = vadd.f32 %v1620_v44, %v583_v52 }
 0x152   : > { %1217 = vst.msk [vmem:[%s1760_s8 + $0x128] sm:$0xff] %vm304_vm0, %v1100_v51  ;;  %v1009_v55 = vpop.f32.mrf.mxu1 }
 0x153   : > { %v729_v56 = vmax.f32 %v584_v54, 0.0  ;;  %v1010_v57 = vadd.f32 %v1752_v45, %v1009_v55 }
 0x154   : > { %1427 = vmatmul.msk.f32.gmra.mxu3 %vm778_vm1, %v760_v53 }
 0x155   : > { %1187 = vst.msk [vmem:[%s1760_s8 + $0x38] sm:$0xff] %vm304_vm0, %v1010_v57  ;;  %1396 = vmatmul.msk.f32.gmra.mxu1 %vm778_vm1, %v729_v56 }
 0x156   : > { %v679_v58 = vpop.f32.mrf.mxu2 }
 0x157   : > { %v680_v59 = vadd.f32 %v1620_v44, %v679_v58  ;;  %v1102_v60 = vpop.f32.mrf.mxu3 }
 0x158   : > { %v1103_v61 = vadd.f32 %v1752_v45, %v1102_v60  ;;  %v586_v62 = vpop.f32.mrf.mxu0 }
 0x159   : > { %v761_v63 = vmax.f32 %v680_v59, 0.0  ;;  %v587_v0 = vadd.f32 %v1620_v44, %v586_v62 }
 0x15a   : > { %1218 = vst.msk [vmem:[%s1760_s8 + $0x130] sm:$0xff] %vm304_vm0, %v1103_v61  ;;  %v1012_v1 = vpop.f32.mrf.mxu1 }
 0x15b   : > { %v730_v2 = vmax.f32 %v587_v0, 0.0  ;;  %v1013_v3 = vadd.f32 %v1752_v45, %v1012_v1 }
 0x15c   : > { %1428 = vmatmul.msk.f32.gmra.mxu3 %vm778_vm1, %v761_v63 }
 0x15d   : > { %1188 = vst.msk [vmem:[%s1760_s8 + $0x40] sm:$0xff] %vm304_vm0, %v1013_v3  ;;  %1397 = vmatmul.msk.f32.gmra.mxu1 %vm778_vm1, %v730_v2 }
 0x15e   : > { %v682_v4 = vpop.f32.mrf.mxu2 }
 0x15f   : > { %v683_v5 = vadd.f32 %v1620_v44, %v682_v4  ;;  %v1105_v6 = vpop.f32.mrf.mxu3 }
 0x160   : > { %v1106_v7 = vadd.f32 %v1752_v45, %v1105_v6  ;;  %v589_v8 = vpop.f32.mrf.mxu0 }
 0x161   : > { %v762_v9 = vmax.f32 %v683_v5, 0.0  ;;  %v590_v10 = vadd.f32 %v1620_v44, %v589_v8 }
 0x162   : > { %1219 = vst.msk [vmem:[%s1760_s8 + $0x138] sm:$0xff] %vm304_vm0, %v1106_v7  ;;  %v1015_v11 = vpop.f32.mrf.mxu1 }
 0x163   : > { %v731_v12 = vmax.f32 %v590_v10, 0.0  ;;  %v1016_v13 = vadd.f32 %v1752_v45, %v1015_v11 }
 0x164   : > { %1429 = vmatmul.msk.f32.gmra.mxu3 %vm778_vm1, %v762_v9 }
 0x165   : > { %1189 = vst.msk [vmem:[%s1760_s8 + $0x48] sm:$0xff] %vm304_vm0, %v1016_v13  ;;  %1398 = vmatmul.msk.f32.gmra.mxu1 %vm778_vm1, %v731_v12 }
 0x166   : > { %v685_v14 = vpop.f32.mrf.mxu2 }
 0x167   : > { %v686_v15 = vadd.f32 %v1620_v44, %v685_v14  ;;  %v1108_v16 = vpop.f32.mrf.mxu3  ;;  %v611_v14 = vadd.f32 %v1620_v44, %v1628_v50 }
 0x168   : > { %v1109_v17 = vadd.f32 %v1752_v45, %v1108_v16  ;;  %v592_v18 = vpop.f32.mrf.mxu0 }
 0x169   : > { %v763_v19 = vmax.f32 %v686_v15, 0.0  ;;  %v593_v20 = vadd.f32 %v1620_v44, %v592_v18 }
 0x16a   : > { %1220 = vst.msk [vmem:[%s1760_s8 + $0x140] sm:$0xff] %vm304_vm0, %v1109_v17  ;;  %v1018_v21 = vpop.f32.mrf.mxu1 }
 0x16b   : > { %v732_v22 = vmax.f32 %v593_v20, 0.0  ;;  %v1019_v23 = vadd.f32 %v1752_v45, %v1018_v21  ;;  %v738_v20 = vmax.f32 %v611_v14, 0.0 }
 0x16c   : > { %1430 = vmatmul.msk.f32.gmra.mxu3 %vm778_vm1, %v763_v19 }
 0x16d   : > { %1190 = vst.msk [vmem:[%s1760_s8 + $0x50] sm:$0xff] %vm304_vm0, %v1019_v23  ;;  %1399 = vmatmul.msk.f32.gmra.mxu1 %vm778_vm1, %v732_v22 }
 0x16e   : > { %v688_v24 = vpop.f32.mrf.mxu2 }
 0x16f   : > { %v689_v25 = vadd.f32 %v1620_v44, %v688_v24  ;;  %v1111_v26 = vpop.f32.mrf.mxu3 }
 0x170   : > { %v1112_v27 = vadd.f32 %v1752_v45, %v1111_v26  ;;  %v595_v28 = vpop.f32.mrf.mxu0 }
 0x171   : > { %v764_v29 = vmax.f32 %v689_v25, 0.0  ;;  %v596_v30 = vadd.f32 %v1620_v44, %v595_v28 }
 0x172   : > { %1221 = vst.msk [vmem:[%s1760_s8 + $0x148] sm:$0xff] %vm304_vm0, %v1112_v27  ;;  %v1021_v31 = vpop.f32.mrf.mxu1 }
 0x173   : > { %v733_v32 = vmax.f32 %v596_v30, 0.0  ;;  %v1022_v33 = vadd.f32 %v1752_v45, %v1021_v31 }
 0x174   : > { %1431 = vmatmul.msk.f32.gmra.mxu3 %vm778_vm1, %v764_v29 }
 0x175   : > { %1191 = vst.msk [vmem:[%s1760_s8 + $0x58] sm:$0xff] %vm304_vm0, %v1022_v33  ;;  %1400 = vmatmul.msk.f32.gmra.mxu1 %vm778_vm1, %v733_v32 }
 0x176   : > { %v691_v34 = vpop.f32.mrf.mxu2 }
 0x177   : > { %v692_v35 = vadd.f32 %v1620_v44, %v691_v34  ;;  %v1114_v36 = vpop.f32.mrf.mxu3 }
 0x178   : > { %v1115_v37 = vadd.f32 %v1752_v45, %v1114_v36  ;;  %v598_v38 = vpop.f32.mrf.mxu0 }
 0x179   : > { %v765_v39 = vmax.f32 %v692_v35, 0.0  ;;  %v599_v40 = vadd.f32 %v1620_v44, %v598_v38 }
 0x17a   : > { %1222 = vst.msk [vmem:[%s1760_s8 + $0x150] sm:$0xff] %vm304_vm0, %v1115_v37  ;;  %v1024_v41 = vpop.f32.mrf.mxu1 }
 0x17b   : > { %v734_v42 = vmax.f32 %v599_v40, 0.0  ;;  %v1025_v43 = vadd.f32 %v1752_v45, %v1024_v41 }
 0x17c   : > { %1432 = vmatmul.msk.f32.gmra.mxu3 %vm778_vm1, %v765_v39 }
 0x17d   : > { %1192 = vst.msk [vmem:[%s1760_s8 + $0x60] sm:$0xff] %vm304_vm0, %v1025_v43  ;;  %1401 = vmatmul.msk.f32.gmra.mxu1 %vm778_vm1, %v734_v42 }
 0x17e   : > { %v694_v46 = vpop.f32.mrf.mxu2 }
 0x17f   : > { %v695_v47 = vadd.f32 %v1620_v44, %v694_v46  ;;  %v1117_v48 = vpop.f32.mrf.mxu3 }
 0x180   : > { %v1118_v49 = vadd.f32 %v1752_v45, %v1117_v48  ;;  %v601_v51 = vpop.f32.mrf.mxu0 }
 0x181   : > { %v766_v52 = vmax.f32 %v695_v47, 0.0  ;;  %v602_v53 = vadd.f32 %v1620_v44, %v601_v51 }
 0x182   : > { %1223 = vst.msk [vmem:[%s1760_s8 + $0x158] sm:$0xff] %vm304_vm0, %v1118_v49  ;;  %v1027_v54 = vpop.f32.mrf.mxu1 }
 0x183   : > { %v735_v55 = vmax.f32 %v602_v53, 0.0  ;;  %v1028_v56 = vadd.f32 %v1752_v45, %v1027_v54 }
 0x184   : > { %1433 = vmatmul.msk.f32.gmra.mxu3 %vm778_vm1, %v766_v52 }
 0x185   : > { %1193 = vst.msk [vmem:[%s1760_s8 + $0x68] sm:$0xff] %vm304_vm0, %v1028_v56  ;;  %1402 = vmatmul.msk.f32.gmra.mxu1 %vm778_vm1, %v735_v55 }
 0x186   : > { %v697_v57 = vpop.f32.mrf.mxu2 }
 0x187   : > { %v698_v58 = vadd.f32 %v1620_v44, %v697_v57  ;;  %v1120_v59 = vpop.f32.mrf.mxu3 }
 0x188   : > { %v1121_v60 = vadd.f32 %v1752_v45, %v1120_v59  ;;  %v604_v61 = vpop.f32.mrf.mxu0 }
 0x189   : > { %v767_v62 = vmax.f32 %v698_v58, 0.0  ;;  %v605_v63 = vadd.f32 %v1620_v44, %v604_v61 }
 0x18a   : > { %1224 = vst.msk [vmem:[%s1760_s8 + $0x160] sm:$0xff] %vm304_vm0, %v1121_v60  ;;  %v1030_v0 = vpop.f32.mrf.mxu1 }
 0x18b   : > { %v736_v1 = vmax.f32 %v605_v63, 0.0  ;;  %v1031_v2 = vadd.f32 %v1752_v45, %v1030_v0 }
 0x18c   : > { %1434 = vmatmul.msk.f32.gmra.mxu3 %vm778_vm1, %v767_v62 }
 0x18d   : > { %1194 = vst.msk [vmem:[%s1760_s8 + $0x70] sm:$0xff] %vm304_vm0, %v1031_v2  ;;  %1403 = vmatmul.msk.f32.gmra.mxu1 %vm778_vm1, %v736_v1 }
 0x18e   : > { %v700_v3 = vpop.f32.mrf.mxu2 }
 0x18f   : > { %v701_v4 = vadd.f32 %v1620_v44, %v700_v3  ;;  %v1123_v5 = vpop.f32.mrf.mxu3 }
 0x190   : > { %v1124_v6 = vadd.f32 %v1752_v45, %v1123_v5  ;;  %v607_v7 = vpop.f32.mrf.mxu0 }
 0x191   : > { %v768_v8 = vmax.f32 %v701_v4, 0.0  ;;  %v608_v9 = vadd.f32 %v1620_v44, %v607_v7 }
 0x192   : > { %1225 = vst.msk [vmem:[%s1760_s8 + $0x168] sm:$0xff] %vm304_vm0, %v1124_v6  ;;  %v1033_v10 = vpop.f32.mrf.mxu1 }
 0x193   : > { %v737_v11 = vmax.f32 %v608_v9, 0.0  ;;  %v1034_v12 = vadd.f32 %v1752_v45, %v1033_v10 }
 0x194   : > { %1435 = vmatmul.msk.f32.gmra.mxu3 %vm778_vm1, %v768_v8 }
 0x195   : > { %1195 = vst.msk [vmem:[%s1760_s8 + $0x78] sm:$0xff] %vm304_vm0, %v1034_v12  ;;  %1404 = vmatmul.msk.f32.gmra.mxu1 %vm778_vm1, %v737_v11 }
 0x196   : > { %v703_v13 = vpop.f32.mrf.mxu2 }
 0x197   : > { %v704_v15 = vadd.f32 %v1620_v44, %v703_v13  ;;  %v1126_v16 = vpop.f32.mrf.mxu3 }
 0x198   : > { %v1127_v17 = vadd.f32 %v1752_v45, %v1126_v16 }
 0x199   : > { %v769_v18 = vmax.f32 %v704_v15, 0.0 }
 0x19a   : > { %1226 = vst.msk [vmem:[%s1760_s8 + $0x170] sm:$0xff] %vm304_vm0, %v1127_v17  ;;  %v1036_v19 = vpop.f32.mrf.mxu1 }
 0x19b   : > { %v1037_v21 = vadd.f32 %v1752_v45, %v1036_v19 }
 0x19c   : > { %1436 = vmatmul.msk.f32.gmra.mxu3 %vm778_vm1, %v769_v18 }
 0x19d   : > { %1196 = vst.msk [vmem:[%s1760_s8 + $0x80] sm:$0xff] %vm304_vm0, %v1037_v21  ;;  %1405 = vmatmul.msk.f32.gmra.mxu1 %vm778_vm1, %v738_v20 }
 0x19f   : > { %v1129_v44 = vpop.f32.mrf.mxu3 }
 0x1a0   : > { %v1130_v50 = vadd.f32 %v1752_v45, %v1129_v44 }
 0x1a2   : > { %1227 = vst.msk [vmem:[%s1760_s8 + $0x178] sm:$0xff] %vm304_vm0, %v1130_v50  ;;  %v1039_v22 = vpop.f32.mrf.mxu1 }
 0x1a3   : > { %v1040_v23 = vadd.f32 %v1752_v45, %v1039_v22 }
 0x1a5   : > { %1197 = vst.msk [vmem:[%s1760_s8 + $0x88] sm:$0xff] %vm304_vm0, %v1040_v23 }
 0x1a7   : > { %v1132_v24 = vpop.f32.mrf.mxu3 }
 0x1a8   : > { %v1133_v25 = vadd.f32 %v1752_v45, %v1132_v24 }
 0x1aa   : > { %1228 = vst.msk [vmem:[%s1760_s8 + $0x180] sm:$0xff] %vm304_vm0, %v1133_v25  ;;  %v1042_v26 = vpop.f32.mrf.mxu1 }
 0x1ab   : > { %v1043_v27 = vadd.f32 %v1752_v45, %v1042_v26 }
 0x1ad   : > { %1198 = vst.msk [vmem:[%s1760_s8 + $0x90] sm:$0xff] %vm304_vm0, %v1043_v27 }
 0x1af   : > { %v1135_v28 = vpop.f32.mrf.mxu3 }
 0x1b0   : > { %v1136_v29 = vadd.f32 %v1752_v45, %v1135_v28 }
 0x1b2   : > { %1229 = vst.msk [vmem:[%s1760_s8 + $0x188] sm:$0xff] %vm304_vm0, %v1136_v29  ;;  %v1045_v30 = vpop.f32.mrf.mxu1 }
 0x1b3   : > { %v1046_v31 = vadd.f32 %v1752_v45, %v1045_v30 }
 0x1b5   : > { %1199 = vst.msk [vmem:[%s1760_s8 + $0x98] sm:$0xff] %vm304_vm0, %v1046_v31 }
 0x1b7   : > { %v1138_v32 = vpop.f32.mrf.mxu3 }
 0x1b8   : > { %v1139_v33 = vadd.f32 %v1752_v45, %v1138_v32 }
 0x1ba   : > { %1230 = vst.msk [vmem:[%s1760_s8 + $0x190] sm:$0xff] %vm304_vm0, %v1139_v33  ;;  %v1048_v34 = vpop.f32.mrf.mxu1 }
 0x1bb   : > { %v1049_v35 = vadd.f32 %v1752_v45, %v1048_v34 }
 0x1bd   : > { %1200 = vst.msk [vmem:[%s1760_s8 + $0xa0] sm:$0xff] %vm304_vm0, %v1049_v35 }
 0x1bf   : > { %v1141_v36 = vpop.f32.mrf.mxu3 }
 0x1c0   : > { %v1142_v37 = vadd.f32 %v1752_v45, %v1141_v36 }
 0x1c2   : > { %1231 = vst.msk [vmem:[%s1760_s8 + $0x198] sm:$0xff] %vm304_vm0, %v1142_v37  ;;  %v1051_v38 = vpop.f32.mrf.mxu1 }
 0x1c3   : > { %v1052_v39 = vadd.f32 %v1752_v45, %v1051_v38 }
 0x1c5   : > { %1201 = vst.msk [vmem:[%s1760_s8 + $0xa8] sm:$0xff] %vm304_vm0, %v1052_v39 }
 0x1c7   : > { %v1144_v40 = vpop.f32.mrf.mxu3 }
 0x1c8   : > { %v1145_v41 = vadd.f32 %v1752_v45, %v1144_v40 }
 0x1ca   : > { %1232 = vst.msk [vmem:[%s1760_s8 + $0x1a0] sm:$0xff] %vm304_vm0, %v1145_v41  ;;  %v1054_v42 = vpop.f32.mrf.mxu1 }
 0x1cb   : > { %v1055_v43 = vadd.f32 %v1752_v45, %v1054_v42 }
 0x1cd   : > { %1202 = vst.msk [vmem:[%s1760_s8 + $0xb0] sm:$0xff] %vm304_vm0, %v1055_v43 }
 0x1cf   : > { %v1147_v46 = vpop.f32.mrf.mxu3 }
 0x1d0   : > { %v1148_v47 = vadd.f32 %v1752_v45, %v1147_v46 }
 0x1d2   : > { %1233 = vst.msk [vmem:[%s1760_s8 + $0x1a8] sm:$0xff] %vm304_vm0, %v1148_v47  ;;  %v1057_v48 = vpop.f32.mrf.mxu1 }
 0x1d3   : > { %v1058_v49 = vadd.f32 %v1752_v45, %v1057_v48 }
 0x1d5   : > { %1203 = vst.msk [vmem:[%s1760_s8 + $0xb8] sm:$0xff] %vm304_vm0, %v1058_v49 }
 0x1d7   : > { %v1150_v51 = vpop.f32.mrf.mxu3 }
 0x1d8   : > { %v1151_v52 = vadd.f32 %v1752_v45, %v1150_v51 }
 0x1da   : > { %1234 = vst.msk [vmem:[%s1760_s8 + $0x1b0] sm:$0xff] %vm304_vm0, %v1151_v52  ;;  %v1060_v53 = vpop.f32.mrf.mxu1 }
 0x1db   : > { %v1061_v54 = vadd.f32 %v1752_v45, %v1060_v53 }
 0x1dd   : > { %1204 = vst.msk [vmem:[%s1760_s8 + $0xc0] sm:$0xff] %vm304_vm0, %v1061_v54 }
 0x1df   : > { %v1153_v55 = vpop.f32.mrf.mxu3 }
 0x1e0   : > { %v1154_v56 = vadd.f32 %v1752_v45, %v1153_v55 }
 0x1e2   : > { %1235 = vst.msk [vmem:[%s1760_s8 + $0x1b8] sm:$0xff] %vm304_vm0, %v1154_v56  ;;  %v1063_v57 = vpop.f32.mrf.mxu1 }
 0x1e3   : > { %v1064_v58 = vadd.f32 %v1752_v45, %v1063_v57 }
 0x1e5   : > { %1205 = vst.msk [vmem:[%s1760_s8 + $0xc8] sm:$0xff] %vm304_vm0, %v1064_v58 }
 0x1e7   : > { %v1156_v59 = vpop.f32.mrf.mxu3 }
 0x1e8   : > { %v1157_v60 = vadd.f32 %v1752_v45, %v1156_v59 }
 0x1ea   : > { %1236 = vst.msk [vmem:[%s1760_s8 + $0x1c0] sm:$0xff] %vm304_vm0, %v1157_v60  ;;  %v1066_v61 = vpop.f32.mrf.mxu1 }
 0x1eb   : > { %v1067_v62 = vadd.f32 %v1752_v45, %v1066_v61 }
 0x1ed   : > { %1206 = vst.msk [vmem:[%s1760_s8 + $0xd0] sm:$0xff] %vm304_vm0, %v1067_v62 }
 0x1ef   : > { %v1159_v63 = vpop.f32.mrf.mxu3 }
 0x1f0   : > { %v1160_v0 = vadd.f32 %v1752_v45, %v1159_v63 }
 0x1f2   : > { %1237 = vst.msk [vmem:[%s1760_s8 + $0x1c8] sm:$0xff] %vm304_vm0, %v1160_v0  ;;  %v1069_v1 = vpop.f32.mrf.mxu1 }
 0x1f3   : > { %v1070_v2 = vadd.f32 %v1752_v45, %v1069_v1 }
 0x1f5   : > { %1207 = vst.msk [vmem:[%s1760_s8 + $0xd8] sm:$0xff] %vm304_vm0, %v1070_v2 }
 0x1f7   : > { %v1162_v3 = vpop.f32.mrf.mxu3 }
 0x1f8   : > { %v1163_v4 = vadd.f32 %v1752_v45, %v1162_v3 }
 0x1fa   : > { %1238 = vst.msk [vmem:[%s1760_s8 + $0x1d0] sm:$0xff] %vm304_vm0, %v1163_v4  ;;  %v1072_v5 = vpop.f32.mrf.mxu1 }
 0x1fb   : > { %v1073_v6 = vadd.f32 %v1752_v45, %v1072_v5 }
 0x1fd   : > { %1208 = vst.msk [vmem:[%s1760_s8 + $0xe0] sm:$0xff] %vm304_vm0, %v1073_v6 }
 0x1ff   : > { %v1165_v7 = vpop.f32.mrf.mxu3 }
 0x200   : > { %v1166_v8 = vadd.f32 %v1752_v45, %v1165_v7 }
 0x202   : > { %1239 = vst.msk [vmem:[%s1760_s8 + $0x1d8] sm:$0xff] %vm304_vm0, %v1166_v8  ;;  %v1075_v9 = vpop.f32.mrf.mxu1 }
 0x203   : > { %v1076_v10 = vadd.f32 %v1752_v45, %v1075_v9 }
 0x205   : > { %1209 = vst.msk [vmem:[%s1760_s8 + $0xe8] sm:$0xff] %vm304_vm0, %v1076_v10 }
 0x207   : > { %v1168_v11 = vpop.f32.mrf.mxu3 }
 0x208   : > { %v1169_v12 = vadd.f32 %v1752_v45, %v1168_v11 }
 0x20a   : > { %1240 = vst.msk [vmem:[%s1760_s8 + $0x1e0] sm:$0xff] %vm304_vm0, %v1169_v12  ;;  %v1078_v13 = vpop.f32.mrf.mxu1 }
 0x20b   : > { %v1079_v14 = vadd.f32 %v1752_v45, %v1078_v13 }
 0x20d   : > { %1210 = vst.msk [vmem:[%s1760_s8 + $0xf0] sm:$0xff] %vm304_vm0, %v1079_v14 }
 0x20f   : > { %v1171_v15 = vpop.f32.mrf.mxu3 }
 0x210   : > { %v1172_v16 = vadd.f32 %v1752_v45, %v1171_v15 }
 0x212   : > { %1241 = vst.msk [vmem:[%s1760_s8 + $0x1e8] sm:$0xff] %vm304_vm0, %v1172_v16  ;;  %v1081_v17 = vpop.f32.mrf.mxu1 }
 0x213   : > { %v1082_v18 = vadd.f32 %v1752_v45, %v1081_v17 }
 0x215   : > { %1211 = vst.msk [vmem:[%s1760_s8 + $0xf8] sm:$0xff] %vm304_vm0, %v1082_v18 }
 0x217   : > { %v1174_v19 = vpop.f32.mrf.mxu3 }
 0x218   : > { %v1175_v20 = vadd.f32 %v1752_v45, %v1174_v19 }
 0x21a   : > { %1242 = vst.msk [vmem:[%s1760_s8 + $0x1f0] sm:$0xff] %vm304_vm0, %v1175_v20  ;;  %v1084_v21 = vpop.f32.mrf.mxu1 }
 0x21b   : > { %v1085_v44 = vadd.f32 %v1752_v45, %v1084_v21 }
 0x21d   : > { %1212 = vst.msk [vmem:[%s1760_s8 + $0x100] sm:$0xff] %vm304_vm0, %v1085_v44 }
 0x21f   : > { %v1177_v50 = vpop.f32.mrf.mxu3 }
 0x220   : > { %v1178_v22 = vadd.f32 %v1752_v45, %v1177_v50 }
 0x222   : > { %1243 = vst.msk [vmem:[%s1760_s8 + $0x1f8] sm:$0xff] %vm304_vm0, %v1178_v22 }
 0x223 PF: > { %s15_s18 = sadd.s32 1, %s1467_s18  }
 0x224   : > { %p12_p4 = scmp.ge.s32.totalorder %s15_s18, 6  }
 0x226   :  { %14 = sbr.rel (!%p12_p4) target bundleno = 1 (0x1), region = 70 }

</bundles_post_ra>
